<compile_context>
chip_gen: v5e
topology: v5e:2x2
jax: 0.10.0
libtpu: 0.0.40
codegen_flags: <defaults>
</compile_context>

<pallas_src>
import functools
import math

import jax
import jax.numpy as jnp
from jax.experimental import pallas as pl
from jax.experimental.pallas import tpu as pltpu

# 48 MiB scoped VMEM: safe on v7x (64 MiB physical); raise to ~100 MiB on v5e/v6e.
_VMEM_LIMIT = 48 * 1024 * 1024
_COMPUTE_DTYPE = jnp.bfloat16   # bf16 MXU operands everywhere; f32 accumulation.


def _round_up(x, m):
    return ((x + m - 1) // m) * m


def _pick_tile(dim, max_tile, align):
    """Largest legal tile <= max_tile; avoids activation padding when possible."""
    if dim <= max_tile:
        return dim                       # full-dim block is always a legal shape
    t = (max_tile // align) * align
    while t >= align:
        if dim % t == 0:
            return t                     # divides dim -> no padding needed
        t -= align
    return (max_tile // align) * align   # fallback: caller pads


# ------------------------- tiled linear (GEMM) kernel ------------------------

def _matmul_kernel(x_ref, w_ref, b_ref, o_ref, acc_ref, *, pre_gelu, activation):
    @pl.when(pl.program_id(2) == 0)
    def _():
        acc_ref[...] = jnp.zeros_like(acc_ref)

    x = x_ref[...]
    if pre_gelu:
        # Wout(F.gelu(x)): gelu fused as a pre-activation (elementwise per K tile).
        # TODO(synk): tanh-approx gelu; PyTorch F.gelu default is exact erf.
        x = jax.nn.gelu(x.astype(jnp.float32)).astype(_COMPUTE_DTYPE)
    else:
        x = x.astype(_COMPUTE_DTYPE)
    # bf16 MXU operands, f32 accumulation.
    acc_ref[...] += jnp.dot(x, w_ref[...].astype(_COMPUTE_DTYPE),
                            preferred_element_type=jnp.float32)

    @pl.when(pl.program_id(2) == pl.num_programs(2) - 1)
    def _():
        y = acc_ref[...] + b_ref[...].astype(jnp.float32)
        if activation == "relu":
            y = jnp.maximum(y, 0.0)
        o_ref[...] = y.astype(o_ref.dtype)


def linear(x, w, b, *, pre_gelu=False, activation=None, tm=512, tn=512, tk=1024):
    """y = act((gelu(x) if pre_gelu else x) @ w + b); x: (..., K), w: (K, N)."""
    orig = x.shape
    K = orig[-1]
    N = w.shape[1]
    M = math.prod(orig[:-1])
    x2 = x.reshape(M, K)

    tm_ = _pick_tile(M, tm, 8)
    tn_ = _pick_tile(N, tn, 128)
    tk_ = _pick_tile(K, tk, 128)
    Mp, Kp, Np = _round_up(M, tm_), _round_up(K, tk_), _round_up(N, tn_)

    if (Mp, Kp) != (M, K):
        x2 = jnp.pad(x2, ((0, Mp - M), (0, Kp - K)))
    wp = jnp.pad(w, ((0, Kp - K), (0, Np - N))) if (Kp, Np) != (K, N) else w
    bp = jnp.pad(b, (0, Np - N)) if Np != N else b

    grid = (Mp // tm_, Np // tn_, Kp // tk_)
    out = pl.pallas_call(
        functools.partial(_matmul_kernel, pre_gelu=pre_gelu, activation=activation),
        out_shape=jax.ShapeDtypeStruct((Mp, Np), x.dtype),
        grid=grid,
        in_specs=[pl.BlockSpec((tm_, tk_), lambda i, j, k: (i, k)),
                  pl.BlockSpec((tk_, tn_), lambda i, j, k: (k, j)),
                  pl.BlockSpec((1, tn_), lambda i, j, k: (0, j))],
        out_specs=pl.BlockSpec((tm_, tn_), lambda i, j, k: (i, j)),
        scratch_shapes=[pltpu.VMEM((tm_, tn_), jnp.float32)],
        compiler_params=pltpu.CompilerParams(
            dimension_semantics=("parallel", "parallel", "arbitrary"),
            vmem_limit_bytes=_VMEM_LIMIT),
        cost_estimate=pl.CostEstimate(
            flops=2 * Mp * Np * Kp, transcendentals=0,
            bytes_accessed=(Mp * Kp + Kp * Np + Mp * Np) * x2.dtype.itemsize),
    )(x2, wp, bp.reshape(1, Np))
    if (Mp, Np) != (M, N):
        out = out[:M, :N]
    return out.reshape(orig[:-1] + (N,))


# ------------- GEMM + bias + residual-add + LayerNorm (fused epilogue) -------

def _matmul_res_ln_kernel(x_ref, w_ref, b_ref, r_ref, g_ref, bln_ref, o_ref,
                          acc_ref, *, eps):
    @pl.when(pl.program_id(1) == 0)
    def _():
        acc_ref[...] = jnp.zeros_like(acc_ref)

    acc_ref[...] += jnp.dot(x_ref[...].astype(_COMPUTE_DTYPE),
                            w_ref[...].astype(_COMPUTE_DTYPE),
                            preferred_element_type=jnp.float32)

    @pl.when(pl.program_id(1) == pl.num_programs(1) - 1)
    def _():
        # post-norm: LayerNorm(residual + (x @ w + b)), all in f32.
        y = (acc_ref[...] + b_ref[...].astype(jnp.float32)
             + r_ref[...].astype(jnp.float32))
        mean = jnp.mean(y, axis=-1, keepdims=True)
        var = jnp.mean(jnp.square(y - mean), axis=-1, keepdims=True)
        y = (y - mean) * jax.lax.rsqrt(var + eps)
        y = y * g_ref[...].astype(jnp.float32) + bln_ref[...].astype(jnp.float32)
        o_ref[...] = y.astype(o_ref.dtype)


def linear_residual_ln(x, w, b, res, g, bln, *, eps=1e-5, tm=512, tk=1024):
    """LayerNorm(res + (x @ w + b)) with the whole epilogue fused into the GEMM."""
    orig = x.shape
    K = orig[-1]
    N = w.shape[1]
    M = math.prod(orig[:-1])
    if N > 4096:  # too wide for a single-N-tile LayerNorm epilogue
        return residual_layer_norm(linear(x, w, b), res, g, bln, eps=eps)

    x2 = x.reshape(M, K)
    r2 = res.reshape(M, N)
    tm_ = _pick_tile(M, tm, 8)
    tk_ = _pick_tile(K, tk, 128)
    Mp, Kp = _round_up(M, tm_), _round_up(K, tk_)
    if (Mp, Kp) != (M, K):
        x2 = jnp.pad(x2, ((0, Mp - M), (0, Kp - K)))
    if Mp != M:
        r2 = jnp.pad(r2, ((0, Mp - M), (0, 0)))
    wp = jnp.pad(w, ((0, Kp - K), (0, 0))) if Kp != K else w

    grid = (Mp // tm_, Kp // tk_)
    out = pl.pallas_call(
        functools.partial(_matmul_res_ln_kernel, eps=eps),
        out_shape=jax.ShapeDtypeStruct((Mp, N), x.dtype),
        grid=grid,
        in_specs=[pl.BlockSpec((tm_, tk_), lambda i, k: (i, k)),
                  pl.BlockSpec((tk_, N), lambda i, k: (k, 0)),
                  pl.BlockSpec((1, N), lambda i, k: (0, 0)),
                  pl.BlockSpec((tm_, N), lambda i, k: (i, 0)),
                  pl.BlockSpec((1, N), lambda i, k: (0, 0)),
                  pl.BlockSpec((1, N), lambda i, k: (0, 0))],
        out_specs=pl.BlockSpec((tm_, N), lambda i, k: (i, 0)),
        scratch_shapes=[pltpu.VMEM((tm_, N), jnp.float32)],
        compiler_params=pltpu.CompilerParams(
            dimension_semantics=("parallel", "arbitrary"),
            vmem_limit_bytes=_VMEM_LIMIT),
        cost_estimate=pl.CostEstimate(
            flops=2 * Mp * N * Kp, transcendentals=0,
            bytes_accessed=(Mp * Kp + Kp * N + 2 * Mp * N) * x2.dtype.itemsize),
    )(x2, wp, b.reshape(1, N), r2, g.reshape(1, N), bln.reshape(1, N))
    if Mp != M:
        out = out[:M]
    return out.reshape(res.shape)


# --------------------- standalone residual + LayerNorm (fallback) ------------

def _residual_layernorm_kernel(x_ref, r_ref, g_ref, b_ref, o_ref, *, eps):
    x = x_ref[...].astype(jnp.float32) + r_ref[...].astype(jnp.float32)
    mean = jnp.mean(x, axis=-1, keepdims=True)
    var = jnp.mean(jnp.square(x - mean), axis=-1, keepdims=True)
    y = (x - mean) * jax.lax.rsqrt(var + eps)
    y = y * g_ref[...].astype(jnp.float32) + b_ref[...].astype(jnp.float32)
    o_ref[...] = y.astype(o_ref.dtype)


def residual_layer_norm(x, res, g, b, *, eps=1e-5, tm=1024):
    orig = x.shape
    D = orig[-1]
    M = math.prod(orig[:-1])
    tm_ = _pick_tile(M, tm, 8)
    Mp = _round_up(M, tm_)
    x2 = x.reshape(M, D)
    r2 = res.reshape(M, D)
    if Mp != M:
        x2 = jnp.pad(x2, ((0, Mp - M), (0, 0)))
        r2 = jnp.pad(r2, ((0, Mp - M), (0, 0)))
    out = pl.pallas_call(
        functools.partial(_residual_layernorm_kernel, eps=eps),
        out_shape=jax.ShapeDtypeStruct((Mp, D), x.dtype),
        grid=(Mp // tm_,),
        in_specs=[pl.BlockSpec((tm_, D), lambda i: (i, 0)),
                  pl.BlockSpec((tm_, D), lambda i: (i, 0)),
                  pl.BlockSpec((1, D), lambda i: (0, 0)),
                  pl.BlockSpec((1, D), lambda i: (0, 0))],
        out_specs=pl.BlockSpec((tm_, D), lambda i: (i, 0)),
        compiler_params=pltpu.CompilerParams(
            dimension_semantics=("parallel",), vmem_limit_bytes=_VMEM_LIMIT),
    )(x2, r2, g.reshape(1, D), b.reshape(1, D))
    return out[:M].reshape(orig)


# ------------- flash-style causal self-attention on the fused QKV ------------

def _flash_qkv_causal_kernel(q_ref, k_ref, v_ref, o_ref, m_sc, l_sc, acc_sc,
                             *, scale, nhead):
    qi = pl.program_id(1)
    ki = pl.program_id(2)
    tq = q_ref.shape[1]
    tk = k_ref.shape[1]
    D = q_ref.shape[2]
    dh = D // nhead

    @pl.when(ki == 0)
    def _():
        m_sc[...] = jnp.full_like(m_sc, -jnp.inf)
        l_sc[...] = jnp.zeros_like(l_sc)
        acc_sc[...] = jnp.zeros_like(acc_sc)

    def tile_update(masked):
        q = q_ref[0]                                   # (tq, D) all heads
        k = k_ref[0]
        v = v_ref[0]
        if masked:                                     # only on the diagonal tile
            row = qi * tq + jax.lax.broadcasted_iota(jnp.int32, (tq, tk), 0)
            col = ki * tk + jax.lax.broadcasted_iota(jnp.int32, (tq, tk), 1)
            causal = col <= row
        for h in range(nhead):                         # static unroll over heads
            hs = slice(h * dh, (h + 1) * dh)
            qh = q[:, hs] * scale                      # scale q once (tq x dh)
            s = jax.lax.dot_general(qh, k[:, hs], (((1,), (1,)), ((), ())),
                                    preferred_element_type=jnp.float32)
            if masked:
                s = jnp.where(causal, s, -jnp.inf)     # tgt_is_causal=True
            m_prev = m_sc[:, h:h + 1]
            m_new = jnp.maximum(m_prev, jnp.max(s, axis=-1, keepdims=True))
            alpha = jnp.exp(m_prev - m_new)
            p = jnp.exp(s - m_new)
            l_sc[:, h:h + 1] = alpha * l_sc[:, h:h + 1] + jnp.sum(p, -1, keepdims=True)
            acc_sc[:, hs] = alpha * acc_sc[:, hs] + jnp.dot(
                p.astype(v.dtype), v[:, hs], preferred_element_type=jnp.float32)
            m_sc[:, h:h + 1] = m_new

    @pl.when(ki < qi)        # strictly below the diagonal: no mask / iota work
    def _():
        tile_update(masked=False)

    @pl.when(ki == qi)       # diagonal tile: apply the causal mask
    def _():
        tile_update(masked=True)
    # ki > qi: fully masked -> compute skipped; the K/V index_map clamp maps
    # these steps onto the already-resident block so no DMA is issued either.

    @pl.when(ki == pl.num_programs(2) - 1)
    def _():
        parts = []
        for h in range(nhead):
            inv = pl.reciprocal(l_sc[:, h:h + 1], approx=True)
            parts.append(acc_sc[:, h * dh:(h + 1) * dh] * inv)
        o_ref[0] = jnp.concatenate(parts, axis=-1).astype(o_ref.dtype)


def fused_qkv_causal_mha(qkv, d_model, nhead, *, tq=512):
    """qkv: (B, S, 3*d_model) fused projection -> (B, S, d_model) attention out.

    No host-side head split/merge transposes: Q/K/V are read as d_model-wide
    column blocks of the fused tensor, heads are sliced inside the kernel.
    """
    B, S, _ = qkv.shape
    D = d_model
    dh = D // nhead
    scale = 1.0 / math.sqrt(dh)

    tq_ = _pick_tile(S, tq, 8)
    Sp = _round_up(S, tq_)

    if D % 128 == 0:
        # Zero-copy column-block access into the fused (B, S, 3D) tensor.
        q_in = qkv if Sp == S else jnp.pad(qkv, ((0, 0), (0, Sp - S), (0, 0)))
        k_in = v_in = q_in
        bq, bk, bv = 0, 1, 2
    else:
        # TODO(synk): d_model not a 128-lane multiple — fall back to a cheap
        # contiguous split (still no transposes).
        q_in, k_in, v_in = qkv[..., :D], qkv[..., D:2 * D], qkv[..., 2 * D:]
        if Sp != S:
            pad = ((0, 0), (0, Sp - S), (0, 0))
            q_in, k_in, v_in = (jnp.pad(q_in, pad), jnp.pad(k_in, pad),
                                jnp.pad(v_in, pad))
        bq = bk = bv = 0

    grid = (B, Sp // tq_, Sp // tq_)
    out = pl.pallas_call(
        functools.partial(_flash_qkv_causal_kernel, scale=scale, nhead=nhead),
        out_shape=jax.ShapeDtypeStruct((B, Sp, D), qkv.dtype),
        grid=grid,
        in_specs=[
            pl.BlockSpec((1, tq_, D), lambda b, qi, ki: (b, qi, bq)),
            # Clamp skipped (ki > qi) steps to the already-resident block so
            # causally-masked K/V tiles are never DMA'd from HBM.
            pl.BlockSpec((1, tq_, D), lambda b, qi, ki: (b, jnp.minimum(ki, qi), bk)),
            pl.BlockSpec((1, tq_, D), lambda b, qi, ki: (b, jnp.minimum(ki, qi), bv)),
        ],
        out_specs=pl.BlockSpec((1, tq_, D), lambda b, qi, ki: (b, qi, 0)),
        scratch_shapes=[pltpu.VMEM((tq_, nhead), jnp.float32),
                        pltpu.VMEM((tq_, nhead), jnp.float32),
                        pltpu.VMEM((tq_, D), jnp.float32)],
        compiler_params=pltpu.CompilerParams(
            dimension_semantics=("parallel", "parallel", "arbitrary"),
            vmem_limit_bytes=_VMEM_LIMIT),
        cost_estimate=pl.CostEstimate(
            flops=2 * B * Sp * Sp * D,
            transcendentals=B * nhead * Sp * Sp // 2,
            bytes_accessed=4 * B * Sp * D * qkv.dtype.itemsize),
    )(q_in, k_in, v_in)
    if Sp != S:
        out = out[:, :S, :]
    return out


# --------------------------- model composition ------------------------------

def decoder_layer(x, p, nhead):
    """Decoder-only layer: causal self-attn + relu FFN, post-norm (eps=1e-5)."""
    B, T, D = x.shape
    # Fused QKV projection: one GEMM against a (D, 3D) weight -> x read once.
    qkv = linear(x, p["wqkv"], p["bqkv"])                          # (B, T, 3D)
    attn = fused_qkv_causal_mha(qkv, D, nhead)                     # (B, T, D)
    # Output projection with bias + residual + post-LayerNorm fused in.
    x = linear_residual_ln(attn, p["wo"], p["bo"], x, p["ln1_g"], p["ln1_b"])
    # memory=None -> cross-attention block is skipped.
    ff = linear(x, p["w1"], p["b1"], activation="relu")
    x = linear_residual_ln(ff, p["w2"], p["b2"], x, p["ln2_g"], p["ln2_b"])
    return x


def v_mortm_forward(params, src):
    # src is (B, S, d_spect); S must be divisible by patch_size.
    B, S, d_spect = src.shape
    patch = params["patch_size"]
    n_patch = S // patch
    x = src.astype(_COMPUTE_DTYPE)
    # Vision: patchify (dropout is identity in eval mode); contiguous reshape.
    v_spect = x.reshape(B, n_patch, patch * d_spect)
    # conv_d_model : Linear(d_spect*patch_size -> d_model)
    x = linear(v_spect, params["conv_d_model_w"], params["conv_d_model_b"])
    # MORTMDecoder (causal, decoder-only)
    for lp in params["layers"]:
        x = decoder_layer(x, lp, params["nhead"])
    # conv_d_spect : Linear(d_model -> d_spect*patch_size)
    x = linear(x, params["conv_d_spect_w"], params["conv_d_spect_b"])
    # UnVision: un-patchify back to (B, S, d_spect); contiguous reshape.
    x = x.reshape(B, S, d_spect)
    # Wout(F.gelu(x)) — gelu fused as a pre-activation inside the GEMM kernel.
    x = linear(x, params["wout_w"], params["wout_b"], pre_gelu=True)
    return x.astype(jnp.float32)


# ------------------------------ parameters ----------------------------------

def init_params(key, *, d_spect, patch_size, d_model, nhead, n_layers, d_ff,
                dtype=_COMPUTE_DTYPE):
    def dense(k, fan_in, fan_out):
        w = jax.random.normal(k, (fan_in, fan_out), jnp.float32) / math.sqrt(fan_in)
        return w.astype(dtype)

    keys = jax.random.split(key, 4 + n_layers)
    f32 = jnp.float32
    params = {
        "patch_size": patch_size,
        "nhead": nhead,
        "conv_d_model_w": dense(keys[0], d_spect * patch_size, d_model),
        "conv_d_model_b": jnp.zeros((d_model,), f32),
        "conv_d_spect_w": dense(keys[1], d_model, d_spect * patch_size),
        "conv_d_spect_b": jnp.zeros((d_spect * patch_size,), f32),
        "wout_w": dense(keys[2], d_spect, d_spect),
        "wout_b": jnp.zeros((d_spect,), f32),
        "layers": [],
    }
    for li in range(n_layers):
        lk = jax.random.split(keys[3 + li], 4)
        params["layers"].append({
            "wqkv": dense(lk[0], d_model, 3 * d_model),
            "bqkv": jnp.zeros((3 * d_model,), f32),
            "wo": dense(lk[1], d_model, d_model), "bo": jnp.zeros((d_model,), f32),
            "w1": dense(lk[2], d_model, d_ff),    "b1": jnp.zeros((d_ff,), f32),
            "w2": dense(lk[3], d_ff, d_model),    "b2": jnp.zeros((d_model,), f32),
            "ln1_g": jnp.ones((d_model,), f32), "ln1_b": jnp.zeros((d_model,), f32),
            "ln2_g": jnp.ones((d_model,), f32), "ln2_b": jnp.zeros((d_model,), f32),
        })
    return params


if __name__ == "__main__":
    # Small synthetic config consistent with the module's constructor.
    # d_model is a 128 multiple so attention uses the zero-copy fused-QKV path.
    D_SPECT, PATCH, D_MODEL, NHEAD, N_LAYERS, D_FF = 8, 4, 128, 4, 2, 256
    B, S = 2, 32  # S divisible by PATCH -> 8 decoder tokens

    key = jax.random.PRNGKey(0)
    pkey, xkey = jax.random.split(key)
    params = init_params(pkey, d_spect=D_SPECT, patch_size=PATCH, d_model=D_MODEL,
                         nhead=NHEAD, n_layers=N_LAYERS, d_ff=D_FF)
    src = jax.random.normal(xkey, (B, S, D_SPECT), jnp.float32)

    out = v_mortm_forward(params, src)
    out = jax.block_until_ready(out)

    assert out.shape == (B, S, D_SPECT), out.shape
    assert bool(jnp.all(jnp.isfinite(out)))
    print("KERNEL_OK")
</pallas_src>

<mosaic_0001>
module attributes {stable_mosaic.version = 11 : i64} {
  func.func @_matmul_kernel(%arg0: i32, %arg1: i32, %arg2: i32, %arg3: memref<16x32xbf16, #tpu.memory_space<vmem>>, %arg4: memref<32x128xbf16, #tpu.memory_space<vmem>>, %arg5: memref<1x128xf32, #tpu.memory_space<vmem>>, %arg6: memref<16x128xbf16, #tpu.memory_space<vmem>>, %arg7: memref<16x128xf32, #tpu.memory_space<vmem>>) attributes {dimension_semantics = [#tpu.dimension_semantics<parallel>, #tpu.dimension_semantics<parallel>, #tpu.dimension_semantics<arbitrary>], iteration_bounds = array<i64: 1, 1, 1>, scalar_prefetch = 0 : i64, scratch_operands = 1 : i64, tpu.core_type = #tpu.core_type<tc>, window_params = [{transform_indices = @transform_0, window_bounds = array<i64: 16, 32>}, {transform_indices = @transform_1, window_bounds = array<i64: 32, 128>}, {transform_indices = @transform_2, window_bounds = array<i64: 1, 128>}, {transform_indices = @transform_3, window_bounds = array<i64: 16, 128>}]} {
    %c0_i32 = arith.constant 0 : i32
    %0 = arith.cmpi eq, %arg2, %c0_i32 : i32
    %1 = arith.extui %0 : i1 to i32
    %c0_i32_0 = arith.constant 0 : i32
    %2 = arith.cmpi ne, %1, %c0_i32_0 : i32
    scf.if %2 {
      %cst_10 = arith.constant 0.000000e+00 : f32
      %12 = vector.broadcast %cst_10 : f32 to vector<16x128xf32>
      %c0_11 = arith.constant 0 : index
      %c0_12 = arith.constant 0 : index
      %13 = vector.load %arg7[%c0_11, %c0_12] : memref<16x128xf32, #tpu.memory_space<vmem>>, vector<16x128xf32>
      tpu.vector_store %arg7[%c0_11, %c0_12], %12 {strides = array<i32>} : memref<16x128xf32, #tpu.memory_space<vmem>>, vector<16x128xf32>,
    } else {
    }
    %c0 = arith.constant 0 : index
    %c0_1 = arith.constant 0 : index
    %3 = vector.load %arg3[%c0, %c0_1] : memref<16x32xbf16, #tpu.memory_space<vmem>>, vector<16x32xbf16>
    %c0_2 = arith.constant 0 : index
    %c0_3 = arith.constant 0 : index
    %4 = vector.load %arg7[%c0_2, %c0_3] : memref<16x128xf32, #tpu.memory_space<vmem>>, vector<16x128xf32>
    %c0_4 = arith.constant 0 : index
    %c0_5 = arith.constant 0 : index
    %5 = vector.load %arg4[%c0_4, %c0_5] : memref<32x128xbf16, #tpu.memory_space<vmem>>, vector<32x128xbf16>
    %cst = arith.constant dense<0.000000e+00> : vector<16x128xf32>
    %6 = tpu.matmul %3, %5, %cst {dimension_numbers = #tpu.dot_dimension_numbers<[1], [0], [0], [1], [0, 0, 1, 1], [], []>} : vector<16x32xbf16>, vector<32x128xbf16>, vector<16x128xf32> -> vector<16x128xf32>
    %7 = arith.addf %4, %6 : vector<16x128xf32>
    %c0_6 = arith.constant 0 : index
    %c0_7 = arith.constant 0 : index
    %8 = vector.load %arg7[%c0_6, %c0_7] : memref<16x128xf32, #tpu.memory_space<vmem>>, vector<16x128xf32>
    tpu.vector_store %arg7[%c0_6, %c0_7], %7 {strides = array<i32>} : memref<16x128xf32, #tpu.memory_space<vmem>>, vector<16x128xf32>,
    %c0_i32_8 = arith.constant 0 : i32
    %9 = arith.cmpi eq, %arg2, %c0_i32_8 : i32
    %10 = arith.extui %9 : i1 to i32
    %c0_i32_9 = arith.constant 0 : i32
    %11 = arith.cmpi ne, %10, %c0_i32_9 : i32
    scf.if %11 {
      %c0_10 = arith.constant 0 : index
      %c0_11 = arith.constant 0 : index
      %12 = vector.load %arg7[%c0_10, %c0_11] : memref<16x128xf32, #tpu.memory_space<vmem>>, vector<16x128xf32>
      %c0_12 = arith.constant 0 : index
      %c0_13 = arith.constant 0 : index
      %13 = vector.load %arg5[%c0_12, %c0_13] : memref<1x128xf32, #tpu.memory_space<vmem>>, vector<1x128xf32>
      %14 = vector.broadcast %13 : vector<1x128xf32> to vector<16x128xf32>
      %15 = arith.addf %12, %14 : vector<16x128xf32>
      %16 = arith.truncf %15 : vector<16x128xf32> to vector<16x128xbf16>
      %c0_14 = arith.constant 0 : index
      %c0_15 = arith.constant 0 : index
      %17 = vector.load %arg6[%c0_14, %c0_15] : memref<16x128xbf16, #tpu.memory_space<vmem>>, vector<16x128xbf16>
      tpu.vector_store %arg6[%c0_14, %c0_15], %16 {strides = array<i32>} : memref<16x128xbf16, #tpu.memory_space<vmem>>, vector<16x128xbf16>,
    } else {
    }
    return
  }
  func.func @transform_0(%arg0: i32, %arg1: i32, %arg2: i32) -> (i32, i32) {
    %c0_i32 = arith.constant 0 : i32
    return %arg0, %arg2 : i32, i32
  }
  func.func @transform_1(%arg0: i32, %arg1: i32, %arg2: i32) -> (i32, i32) {
    %c0_i32 = arith.constant 0 : i32
    return %arg2, %arg1 : i32, i32
  }
  func.func @transform_2(%arg0: i32, %arg1: i32, %arg2: i32) -> (i32, i32) {
    %c0_i32 = arith.constant 0 : i32
    %c0_i32_0 = arith.constant 0 : i32
    return %c0_i32, %arg1 : i32, i32
  }
  func.func @transform_3(%arg0: i32, %arg1: i32, %arg2: i32) -> (i32, i32) {
    %c0_i32 = arith.constant 0 : i32
    return %arg0, %arg1 : i32, i32
  }
}

</mosaic_0001>

<bundles_post_ra>
// kernel: tpu_custom_call.1
= control target key start
LH: loop header
LB: loop body
LE: loop exit
PB: predicated region body
PF: predicated region fallthrough
CT: control target
= control target key end

     0   :  { %8 = vsyncpa [#allocation4], 0  ;;  %s287_s0 = inlined_call_operand.hbm [shape: bf16[16,32], index: 0, kind: input, shape index: {}]   ;;  %s288_s1 = inlined_call_operand.hbm [shape: bf16[32,128], index: 1, kind: input, shape index: {}]   ;;  %s289_s2 = inlined_call_operand.vmem [shape: f32[1,128], index: 2, kind: input, shape index: {}]   ;;  %s290_s3 = inlined_call_operand.hbm [shape: bf16[16,128], index: 3, kind: output, shape index: {}]  }
   0x1   :  { %9 = vsyncpa [#allocation7], 0 }
   0x2   :  { %10 = vsyncpa [#allocation5], 0  ;;  %s15_s14 = sshll.u32 %s287_s0, 4  ;;  %s241_s15 = smov [#allocation3]   ;;  %s16_s14 = int_to_ptr.hbm [resolvable:$true] %s15_s14 }
   0x3   :  { %s17_s16 = sshll.u32 %s241_s15, 4  ;;  %s28_s19 = sshll.u32 %s288_s1, 4  ;;  %s18_s16 = int_to_ptr.vmem [resolvable:$true] %s17_s16  ;;  %s29_s19 = int_to_ptr.hbm [resolvable:$true] %s28_s19 }
   0x4   :  { %s242_s20 = smov 64   ;;  %s243_s21 = smov 4  }
   0x5   :  { %23 = dma.hbm_to_vmem [thread:$0]  %s16_s14, 128, %s18_s16, [#allocation4], %s242_s20, %s242_s20, %s243_s21  }
   0x6   :  { %s244_s22 = smov [#allocation6]  }
   0x7   :  { %s30_s23 = sshll.u32 %s244_s22, 4  ;;  %s31_s23 = int_to_ptr.vmem [resolvable:$true] %s30_s23 }
   0x8   :  { %36 = dma.hbm_to_vmem [thread:$0]  %s29_s19, 256, %s31_s23, [#allocation7], %s242_s20, %s242_s20, %s243_s21  }
   0x9   :  { %235 = dma.done.wait [#allocation4], 128  }
   0xa   :  { %236 = vsyncadd [#allocation4], 4294967168 }
   0xb   :  { %237 = dma.done.wait [#allocation7], 256  }
   0xc   :  { %238 = vsyncadd [#allocation7], 4294967040  ;;  %v151_v0 = vld [vmem:[#allocation6 + $0x8] sm:$0xff]  ;;  %v150_v1 = vld [vmem:[#allocation6] sm:$0xff]  ;;  %vm79_vm0 = vcmask 261120   ;;  %s245_s24 = smov [#allocation8]  }
   0xd   :  { %89 = vmatpush.bf16.msra.mxu0 %v151_v0  ;;  %v149_v2 = vld [vmem:[#allocation3] sm:$0xff]  ;;  %s120_s25 = sshll.u32 %s245_s24, 4  ;;  %s122_s28 = sshll.u32 %s290_s3, 4  ;;  %s121_s25 = int_to_ptr.vmem [resolvable:$true] %s120_s25  ;;  %s123_s28 = int_to_ptr.hbm [resolvable:$true] %s122_s28 }
   0xe   :  { %v162_v4 = vld [vmem:[%s289_s2] ss:$0 sm:$0xff] }
  0x11   :  { %90 = vmatpush.bf16.msra.mxu0 %v150_v1 }
  0x14   :  { %148 = vmatmul.msk.bf16.vlgmr.msra.gmra.mxu0 %vm79_vm0, %v149_v2 }
  0x91   :  { %v92_v3 = vpop.f32.mrf.mxu0 }
  0x92   :  { %v110_v6 = vadd.f32 %v162_v4, %v92_v3 }
  0x99   :  { %v94_v5 = vpop.f32.mrf.mxu0 }
  0x9a   :  { %v111_v7 = vadd.f32 %v162_v4, %v94_v5 }
  0x9c   :  { %v155_v8 = vpack.c.bf16 %v111_v7, %v110_v6 }
  0x9e   :  { %156 = vst [vmem:[#allocation8] sm:$0xff] %v155_v8  }
  0x9f   :  { %128 = dma.vmem_to_hbm [thread:$0]  %s121_s25, 128, %s123_s28, [#allocation5], %s242_s20, %s242_s20, %s243_s21  }
  0xa0   :  { %239 = dma.done.wait [#allocation5], 128  }
  0xa1   :  { %240 = vsyncadd [#allocation5], 4294967168 }
  0xa2   :  { %133 = vsyncpa [#allocation4], 1 }
  0xa3   :  { %134 = vsyncpa [#allocation7], 1 }
  0xa4   :  { %135 = vsyncpa [#allocation5], 1 }

</bundles_post_ra>
